<compile_context>
chip_gen: v7x
topology: tpu7x:2x2x1
jax: 0.10.0
libtpu: 0.0.40
codegen_flags: <defaults>
</compile_context>

<pallas_src>
import functools

import jax
import jax.numpy as jnp
from jax.experimental import pallas as pl
from jax.experimental.pallas import tpu as pltpu


_LANES = 384                  # 128 batch entries x 3 species per (free) row
_DEFAULT_MAX_ROWS = 2048      # 2048 x 384 f32 = 3 MiB/tile -> ~12 MiB double-buffered
_PALLAS_MIN_BATCH = 32768     # below this, a fused jnp expression beats a kernel launch
_VMEM_LIMIT_BYTES = 40 * 1024 * 1024  # explicit: v5e default scoped limit is only 16 MiB


@functools.lru_cache(maxsize=None)
def _roll_matches_jnp_roll() -> bool:
    """Pin pltpu.roll's direction once with a tiny probe kernel.

    In current JAX pltpu.roll(x, s, axis) == jnp.roll(x, s, axis)
    (result[i] = x[i - s]); the probe keeps the main kernel correct even if
    that convention ever differs.
    """
    def probe(x_ref, o_ref):
        o_ref[...] = pltpu.roll(x_ref[...], 1, axis=1)

    x = jax.lax.broadcasted_iota(jnp.float32, (8, 128), 1)
    out = pl.pallas_call(
        probe, out_shape=jax.ShapeDtypeStruct((8, 128), jnp.float32))(x)
    return bool(jax.device_get(out)[0, 1] == 0.0)


def _make_mech_kernel(shift_prev: int, shift_next: int):
    """Kernel over a (R, 384) lane-dense tile of the flattened (B, 3) state."""

    def kernel(w_ref, x_ref, o_ref):
        # w_ref: (3, 384) f32 per-lane weights (resident: same block every step).
        # x_ref / o_ref: (R, 384) tiles; lane p holds species (p % 3) of a row.
        x = x_ref[...].astype(jnp.float32)
        x_prev = pltpu.roll(x, shift_prev, axis=1)   # lane p -> x[p - 1]
        x_next = pltpu.roll(x, shift_next, axis=1)   # lane p -> x[p + 1]
        out = w_ref[0:1, :] * x + w_ref[1:2, :] * x_prev + w_ref[2:3, :] * x_next
        o_ref[...] = out.astype(o_ref.dtype)         # single full-tile unmasked store

    return kernel


def _lane_weights(k):
    """Build the (3, 384) f32 per-lane weight rows from the rate constants.

    Per batch row (phase = lane % 3), with p the lane index:
      phase 0: dCa/dt = -k0*Ca + k1*Cb        = -k0*x[p]        + k1*x[p+1]
      phase 1: dCb/dt =  k0*Ca - (k1+2k2)*Cb  =  k0*x[p-1] - (k1+2k2)*x[p]
      phase 2: dCc/dt =  k2*Cb                =  k2*x[p-1]
    Weights whose source would wrap across a row boundary are exactly zero.
    """
    k = k.astype(jnp.float32)
    zero = jnp.zeros((), jnp.float32)
    w_self = jnp.stack([-k[0], -(k[1] + 2.0 * k[2]), zero])
    w_prev = jnp.stack([zero, k[0], k[2]])
    w_next = jnp.stack([k[1], zero, zero])
    return jnp.tile(jnp.stack([w_self, w_prev, w_next]), (1, _LANES // 3))


def _mech_jnp(k, x):
    """Fused plain-jnp path (small-batch fast path; reference math in f32)."""
    k = k.astype(jnp.float32)
    xf = x.astype(jnp.float32)
    Ca = xf[:, 0:1]
    Cb = xf[:, 1:2]
    dCadt = -k[0] * Ca + k[1] * Cb
    dCbdt = k[0] * Ca - k[1] * Cb - k[2] * 2.0 * Cb
    dCcdt = k[2] * Cb
    return jnp.concatenate([dCadt, dCbdt, dCcdt], axis=1).astype(x.dtype)


def mech_forward(k, N_t, x, z=0, t=0, *, max_rows=_DEFAULT_MAX_ROWS, use_pallas=None):
    """Pallas equivalent of MechMod.forward(N_t, x, z, t).

    N_t, z, t are accepted for signature parity but (as in the torch module)
    do not affect the computation.  x is (B, 3) = (Ca, Cb, Cc) per row.
    """
    del N_t, z, t
    B, S = x.shape
    assert S == 3, "MechMod expects 3 species (Ca, Cb, Cc)"

    if use_pallas is None:
        use_pallas = B >= _PALLAS_MIN_BATCH
    if not use_pallas:
        return _mech_jnp(k, x)

    # Free lane-dense view: (B, 3) -> (B/128, 384).  Only a ragged batch needs a
    # sliver pad (<= 127 rows); aligned batches touch HBM exactly once each way.
    pad = (-B) % 128
    xp = jnp.pad(x, ((0, pad), (0, 0))) if pad else x
    rows = (B + pad) // 128
    x2d = xp.reshape(rows, _LANES)

    if rows <= max_rows:
        tile_rows = rows                          # single tile: block == full dim is legal
    else:
        tile_rows = max(8, (max_rows // 8) * 8)   # sublane blocking must be 8-aligned

    # NOTE(v7x): with 2 TensorCores splitting the "parallel" grid, prefer
    # tile sizes that give >= 4 tiles when B is large enough.
    grid = (pl.cdiv(rows, tile_rows),)

    if _roll_matches_jnp_roll():
        shift_prev, shift_next = 1, _LANES - 1
    else:
        shift_prev, shift_next = _LANES - 1, 1

    out2d = pl.pallas_call(
        _make_mech_kernel(shift_prev, shift_next),
        out_shape=jax.ShapeDtypeStruct((rows, _LANES), x.dtype),
        grid_spec=pltpu.PrefetchScalarGridSpec(
            num_scalar_prefetch=0,
            grid=grid,
            in_specs=[
                pl.BlockSpec((3, _LANES), lambda i: (0, 0)),          # f32 weights (resident)
                pl.BlockSpec((tile_rows, _LANES), lambda i: (i, 0)),  # x tile
            ],
            out_specs=pl.BlockSpec((tile_rows, _LANES), lambda i: (i, 0)),
        ),
        compiler_params=pltpu.CompilerParams(
            dimension_semantics=("parallel",),
            vmem_limit_bytes=_VMEM_LIMIT_BYTES,
        ),
    )(_lane_weights(k), x2d)

    out = out2d.reshape(rows * 128, 3)
    return out[:B] if pad else out


def mech_forward_ref(k, x):
    """Plain-JAX transcription of the torch module, for correctness checks."""
    Ca = x[:, 0:1]
    Cb = x[:, 1:2]
    dCadt = -k[0] * Ca + k[1] * Cb
    dCbdt = k[0] * Ca - k[1] * Cb - k[2] * 2.0 * Cb
    dCcdt = k[2] * Cb
    return jnp.concatenate([dCadt, dCbdt, dCcdt], axis=1)


if __name__ == "__main__":
    key = jax.random.PRNGKey(0)

    # MechMod.__init__: k = [1., 1., 1.]
    k = jnp.array([1.0, 1.0, 1.0], dtype=jnp.float32)

    # Primary check: small batch, force the Pallas path (single (2, 384) tile).
    B = 256
    x = jax.random.uniform(key, (B, 3), dtype=jnp.float32)
    out = jax.block_until_ready(mech_forward(k, B, x, use_pallas=True))
    ref = mech_forward_ref(k, x)
    assert out.shape == (B, 3)
    assert jnp.allclose(out, ref, atol=1e-6, rtol=1e-6), "mismatch vs reference"

    # Secondary check: non-trivial k, ragged batch, multi-tile grid (small tile
    # override exercises the sliver-pad and ragged-last-block paths cheaply).
    k2 = jnp.array([0.5, 1.3, 0.7], dtype=jnp.float32)
    B2 = 1200
    x2 = jax.random.uniform(jax.random.PRNGKey(1), (B2, 3), dtype=jnp.float32)
    out2 = jax.block_until_ready(mech_forward(k2, B2, x2, use_pallas=True, max_rows=8))
    assert out2.shape == (B2, 3)
    assert jnp.allclose(out2, mech_forward_ref(k2, x2), atol=1e-6, rtol=1e-6), \
        "mismatch vs reference (grid path)"

    # Small-B auto fast path (no kernel launch).
    x3 = jax.random.uniform(jax.random.PRNGKey(2), (8, 3), dtype=jnp.float32)
    out3 = jax.block_until_ready(mech_forward(k, 8, x3))
    assert jnp.allclose(out3, mech_forward_ref(k, x3), atol=1e-6, rtol=1e-6)

    print("KERNEL_OK")
</pallas_src>

<mosaic_0001>
module attributes {stable_mosaic.version = 11 : i64} {
  func.func @probe(%arg0: memref<8x128xf32, #tpu.memory_space<vmem>>, %arg1: memref<8x128xf32, #tpu.memory_space<vmem>>) attributes {dimension_semantics = [], scalar_prefetch = 0 : i64, scratch_operands = 0 : i64, tpu.core_type = #tpu.core_type<tc>} {
    %c0 = arith.constant 0 : index
    %c0_0 = arith.constant 0 : index
    %0 = vector.load %arg0[%c0, %c0_0] : memref<8x128xf32, #tpu.memory_space<vmem>>, vector<8x128xf32>
    %c1_i32 = arith.constant 1 : i32
    %1 = tpu.dynamic_rotate %0 by %c1_i32 dim 1 : vector<8x128xf32>, i32 -> vector<8x128xf32>
    %c0_1 = arith.constant 0 : index
    %c0_2 = arith.constant 0 : index
    %2 = vector.load %arg1[%c0_1, %c0_2] : memref<8x128xf32, #tpu.memory_space<vmem>>, vector<8x128xf32>
    tpu.vector_store %arg1[%c0_1, %c0_2], %1 {strides = array<i32>} : memref<8x128xf32, #tpu.memory_space<vmem>>, vector<8x128xf32>,
    return
  }
}

</mosaic_0001>

<bundles_post_ra>
// kernel: tpu_custom_call.1
= control target key start
LH: loop header
LB: loop body
LE: loop exit
PB: predicated region body
PF: predicated region fallthrough
CT: control target
= control target key end

     0   :  { %6 = vsyncpa [#allocation3], 0  ;;  %s128_s0 = inlined_call_operand.hbm [shape: f32[8,128], index: 0, kind: input, shape index: {}]   ;;  %s129_s1 = inlined_call_operand.hbm [shape: f32[8,128], index: 1, kind: output, shape index: {}]  }
   0x1   :  { %7 = vsyncpa [#allocation4], 0  ;;  %s91_s6 = smov [#allocation2]   ;;  %s43_s10 = scalar_lea.hbm %s128_s0, 128 }
   0x2   :  { %s14_s7 = sshll.u32 %s91_s6, 4  ;;  %p44_p0 = scmp.ne.s32.totalorder %s128_s0, %s43_s10  ;;  %s15_s7 = int_to_ptr.vmem [resolvable:$true] %s14_s7 }
   0x3   :  { %p47_p1 = scmp.lt.u32.totalorder %s43_s10, %s128_s0 }
   0x5   :  { %p49_p2 = pnand %p47_p1, %p44_p0 }
   0x7   :  { %52 = shalt.err (!%p49_p2)
}
   0x8   :  { %s53_s15 = scalar_lea.vmem %s15_s7, 128  ;;  %p58_p4 = scmp.lt.s32.totalorder %s15_s7, %s15_s7 }
   0x9   :  { %p54_p3 = scmp.ne.s32.totalorder %s15_s7, %s53_s15  ;;  %p59_p5 = scmp.lt.s32.totalorder %s53_s15, %s53_s15 }
   0xb   :  { %p60_p6 = por %p59_p5, %p58_p4 }
   0xd   :  { %p61_p7 = pnand %p60_p6, %p54_p3 }
   0xf   :  { %64 = shalt.err (!%p61_p7)
}
  0x10   :  { %17 = dma.hbm_to_vmem [thread:$0]  %s128_s0, 128, %s15_s7, [#allocation3]  }
  0x11   :  { %87 = dma.done.wait [#allocation3], 128  }
  0x12   :  { %88 = vsyncadd [#allocation3], 4294967168  ;;  %v21_v0 = vld [vmem:[#allocation2] sm:$0xff]  ;;  %s92_s18 = smov 1   ;;  %s93_s19 = smov [#allocation5]  }
  0x13   :  { %22 = vrot.lane.b32.xlu0 %v21_v0, %s92_s18  ;;  %s31_s20 = sshll.u32 %s93_s19, 4  ;;  %s32_s20 = int_to_ptr.vmem [resolvable:$true] %s31_s20 }
  0x14   :  { %s65_s21 = scalar_lea.vmem %s32_s20, 128  ;;  %p70_p9 = scmp.lt.s32.totalorder %s32_s20, %s32_s20 }
  0x15   :  { %p66_p8 = scmp.ne.s32.totalorder %s32_s20, %s65_s21  ;;  %p71_p10 = scmp.lt.s32.totalorder %s65_s21, %s65_s21 }
  0x17   :  { %p72_p11 = por %p71_p10, %p70_p9 }
  0x19   :  { %p73_p12 = pnand %p72_p11, %p66_p8 }
  0x85   :  { %v23_v1 = vpop.permute.xlu0 %22 }
  0x86   :  { %24 = vst [vmem:[#allocation5] sm:$0xff] %v23_v1 }
  0x87   :  { %76 = shalt.err (!%p73_p12)
}
  0x88   :  { %s77_s0 = scalar_lea.hbm %s129_s1, 128 }
  0x89   :  { %p78_p13 = scmp.ne.s32.totalorder %s129_s1, %s77_s0  ;;  %p81_p0 = scmp.lt.u32.totalorder %s77_s0, %s129_s1 }
  0x8b   :  { %p83_p1 = pnand %p81_p0, %p78_p13 }
  0x8d   :  { %86 = shalt.err (!%p83_p1)
}
  0x8e   :  { %34 = dma.vmem_to_hbm [thread:$0]  %s32_s20, 128, %s129_s1, [#allocation4]  }
  0x8f   :  { %89 = dma.done.wait [#allocation4], 128  }
  0x90   :  { %90 = vsyncadd [#allocation4], 4294967168 }
  0x91   :  { %38 = vsyncpa [#allocation3], 1 }
  0x92   :  { %39 = vsyncpa [#allocation4], 1 }

</bundles_post_ra>
